<compile_context>
chip_gen: v7x
topology: tpu7x:2x2x1
jax: 0.10.0
libtpu: 0.0.40
codegen_flags: <defaults>
</compile_context>

<pallas_src>
import functools

import jax
import jax.numpy as jnp
from jax.experimental import pallas as pl
from jax.experimental.pallas import tpu as pltpu

LANE = 128  # TPU lane width


def _round_up(v, m):
    return -(-v // m) * m


def _net_kernel(x_ref, w1_ref, b1_ref, w2_ref, b2_ref, out_ref, *, out_dim):
    x = x_ref[...]                                              # (TB, IN) f32

    # fc1 + ReLU
    h = jnp.dot(x, w1_ref[...], preferred_element_type=jnp.float32) + b1_ref[...]
    h = jnp.maximum(h, 0.0)                                     # (TB, H)

    # fc2 (output columns padded to 128 lanes; pad columns have zero weight
    # and a very negative bias so they vanish under softmax).
    logits = jnp.dot(h, w2_ref[...], preferred_element_type=jnp.float32) + b2_ref[...]

    # Numerically stable softmax over the lane (feature) axis, exact division.
    m = jnp.max(logits, axis=-1, keepdims=True)
    e = jnp.exp(logits - m)
    probs = e / jnp.sum(e, axis=-1, keepdims=True)              # (TB, OUT_PAD)

    # Transpose the tile-aligned (TB, OUT_PAD) slab on the XLU (idle slot) and
    # store only the real action rows as a lane-dense (OUT, TB) block.
    out_ref[...] = probs.T[:out_dim, :].astype(out_ref.dtype)


def pack_params(w1, b1, w2, b2):
    """One-time parameter prep (call when weights change, NOT every forward).

    fc2's output columns are zero-padded to a full 128-lane tile; padded
    columns get a dtype-derived very-negative bias so exp() underflows to
    exactly 0 and the softmax over padded lanes equals the softmax over the
    real actions.
    """
    hid_dim, out_dim = w2.shape
    out_pad = _round_up(out_dim, LANE)
    neg = jnp.finfo(jnp.float32).min / 2
    w2p = jnp.zeros((hid_dim, out_pad), jnp.float32).at[:, :out_dim].set(
        w2.astype(jnp.float32))
    b2p = jnp.full((1, out_pad), neg, jnp.float32).at[:, :out_dim].set(
        jnp.reshape(b2, (1, out_dim)).astype(jnp.float32))
    return (w1.astype(jnp.float32),
            jnp.reshape(b1, (1, w1.shape[1])).astype(jnp.float32),
            w2p, b2p)


@functools.partial(jax.jit, static_argnames=("out_dim", "block_b"))
def net_forward(x, w1, b1, w2p, b2p, *, out_dim, block_b=512):
    """softmax(relu(x @ w1 + b1) @ w2 + b2, axis=1) for x: (B, IN) float32.

    w1: (IN, H), b1: (1, H), w2p: (H, OUT_PAD), b2p: (1, OUT_PAD) — produced
    once by pack_params().  Returns (B, OUT) action probabilities.
    """
    B, in_dim = x.shape

    # ---- batch tiling ----------------------------------------------------
    # The output block's lane axis is the batch, so tiles must be 128-aligned
    # (or the full extent).  Keep >= 2 tiles when possible so the "parallel"
    # grid axis can be sharded across both v7x TensorCores.
    block_b = max(LANE, (block_b // LANE) * LANE)
    b128 = _round_up(B, LANE)
    if b128 >= 2 * LANE:
        tb = max(LANE, min(block_b, (b128 // 2 // LANE) * LANE))
    else:
        tb = b128
    b_pad = _round_up(b128, tb)
    if b_pad != B:
        x = jnp.pad(x, ((0, b_pad - B), (0, 0)))    # pad rows sliced off below

    kernel = functools.partial(_net_kernel, out_dim=out_dim)
    out = pl.pallas_call(
        kernel,
        out_shape=jax.ShapeDtypeStruct((out_dim, b_pad), jnp.float32),
        grid_spec=pltpu.PrefetchScalarGridSpec(
            num_scalar_prefetch=0,
            grid=(b_pad // tb,),
            in_specs=[
                pl.BlockSpec((tb, in_dim), lambda i: (i, 0)),   # x streams
                pl.BlockSpec(w1.shape, lambda i: (0, 0)),       # pinned, DMA'd once
                pl.BlockSpec(b1.shape, lambda i: (0, 0)),
                pl.BlockSpec(w2p.shape, lambda i: (0, 0)),
                pl.BlockSpec(b2p.shape, lambda i: (0, 0)),
            ],
            out_specs=pl.BlockSpec((out_dim, tb), lambda i: (0, i)),
        ),
        compiler_params=pltpu.CompilerParams(
            dimension_semantics=("parallel",),      # batch tiles over v7x's 2 TCs
        ),
    )(x, w1, b1, w2p, b2p)

    # Lane-contiguous slice of the real batch, then a tiny (OUT, B) -> (B, OUT)
    # transpose to match the module's output convention (softmax over dim=1).
    return out[:, :B].T


def init_params(key, input_size, hidden_size, output_size):
    # Mirrors Net.initialize_weights(): weights ~ Normal(mean=0.01, std=1.0),
    # biases = 0.01 (constant). Stored transposed relative to nn.Linear.
    k1, k2 = jax.random.split(key)
    w1 = 0.01 + jax.random.normal(k1, (input_size, hidden_size), dtype=jnp.float32)
    b1 = jnp.full((1, hidden_size), 0.01, dtype=jnp.float32)
    w2 = 0.01 + jax.random.normal(k2, (hidden_size, output_size), dtype=jnp.float32)
    b2 = jnp.full((1, output_size), 0.01, dtype=jnp.float32)
    return w1, b1, w2, b2


if __name__ == "__main__":
    # Module-consistent sizes; batch 256 = many rollout observations fused
    # into one pallas_call (amortizes launch overhead; 2 x 128-row tiles so a
    # v7x megacore gets one tile per TensorCore).
    B, IN, H, OUT = 256, 16, 32, 4

    key = jax.random.PRNGKey(0)
    kx, kp = jax.random.split(key)
    x = jax.random.normal(kx, (B, IN), dtype=jnp.float32)
    w1, b1, w2, b2 = init_params(kp, IN, H, OUT)

    # Hoisted, one-time packing (perf feedback): the per-step forward is just
    # the pallas_call, with no per-call concatenate / pad kernels.
    params = pack_params(w1, b1, w2, b2)

    probs = net_forward(x, *params, out_dim=OUT)
    jax.block_until_ready(probs)

    # Reference check in plain JAX (same math as the PyTorch forward).
    h_ref = jnp.maximum(x @ w1 + b1, 0.0)
    ref = jax.nn.softmax(h_ref @ w2 + b2, axis=1)
    assert probs.shape == (B, OUT)
    assert jnp.allclose(probs, ref, atol=1e-4, rtol=1e-3)
    # Exact division in-kernel -> rows sum to 1 at float32 precision.
    assert jnp.allclose(jnp.sum(probs, axis=1), 1.0, atol=1e-5)

    # TODO(synk): Categorical action sampling / log-prob loss from the RL
    # agent live outside Net.forward and are left to the host JAX program.
    # TODO(synk): for very large rollout batches, stream x (and w1) as
    # bfloat16 with f32 accumulation to halve input HBM traffic.
    print("KERNEL_OK")
</pallas_src>

<mosaic_0001>
module attributes {stable_mosaic.version = 11 : i64} {
  func.func @_net_kernel(%arg0: i32, %arg1: memref<128x16xf32, #tpu.memory_space<vmem>>, %arg2: memref<16x32xf32, #tpu.memory_space<vmem>>, %arg3: memref<1x32xf32, #tpu.memory_space<vmem>>, %arg4: memref<32x128xf32, #tpu.memory_space<vmem>>, %arg5: memref<1x128xf32, #tpu.memory_space<vmem>>, %arg6: memref<4x128xf32, #tpu.memory_space<vmem>>) attributes {dimension_semantics = [#tpu.dimension_semantics<parallel>], iteration_bounds = array<i64: 2>, scalar_prefetch = 0 : i64, scratch_operands = 0 : i64, tpu.core_type = #tpu.core_type<tc>, window_params = [{transform_indices = @transform_0, window_bounds = array<i64: 128, 16>}, {pipeline_mode = #tpu.pipeline_mode<synchronous>, transform_indices = @transform_1, window_bounds = array<i64: 16, 32>}, {pipeline_mode = #tpu.pipeline_mode<synchronous>, transform_indices = @transform_2, window_bounds = array<i64: 1, 32>}, {pipeline_mode = #tpu.pipeline_mode<synchronous>, transform_indices = @transform_3, window_bounds = array<i64: 32, 128>}, {pipeline_mode = #tpu.pipeline_mode<synchronous>, transform_indices = @transform_4, window_bounds = array<i64: 1, 128>}, {transform_indices = @transform_5, window_bounds = array<i64: 4, 128>}]} {
    %c0 = arith.constant 0 : index
    %c0_0 = arith.constant 0 : index
    %0 = vector.load %arg1[%c0, %c0_0] : memref<128x16xf32, #tpu.memory_space<vmem>>, vector<128x16xf32>
    %c0_1 = arith.constant 0 : index
    %c0_2 = arith.constant 0 : index
    %1 = vector.load %arg2[%c0_1, %c0_2] : memref<16x32xf32, #tpu.memory_space<vmem>>, vector<16x32xf32>
    %cst = arith.constant dense<0.000000e+00> : vector<128x32xf32>
    %2 = tpu.matmul %0, %1, %cst {dimension_numbers = #tpu.dot_dimension_numbers<[1], [0], [0], [1], [0, 0, 1, 1], [], []>} : vector<128x16xf32>, vector<16x32xf32>, vector<128x32xf32> -> vector<128x32xf32>
    %c0_3 = arith.constant 0 : index
    %c0_4 = arith.constant 0 : index
    %3 = vector.load %arg3[%c0_3, %c0_4] : memref<1x32xf32, #tpu.memory_space<vmem>>, vector<1x32xf32>
    %4 = vector.broadcast %3 : vector<1x32xf32> to vector<128x32xf32>
    %5 = arith.addf %2, %4 : vector<128x32xf32>
    %cst_5 = arith.constant 0.000000e+00 : f32
    %6 = vector.broadcast %cst_5 : f32 to vector<128x32xf32>
    %7 = arith.maximumf %5, %6 : vector<128x32xf32>
    %c0_6 = arith.constant 0 : index
    %c0_7 = arith.constant 0 : index
    %8 = vector.load %arg4[%c0_6, %c0_7] : memref<32x128xf32, #tpu.memory_space<vmem>>, vector<32x128xf32>
    %cst_8 = arith.constant dense<0.000000e+00> : vector<128x128xf32>
    %9 = tpu.matmul %7, %8, %cst_8 {dimension_numbers = #tpu.dot_dimension_numbers<[1], [0], [0], [1], [0, 0, 1, 1], [], []>} : vector<128x32xf32>, vector<32x128xf32>, vector<128x128xf32> -> vector<128x128xf32>
    %c0_9 = arith.constant 0 : index
    %c0_10 = arith.constant 0 : index
    %10 = vector.load %arg5[%c0_9, %c0_10] : memref<1x128xf32, #tpu.memory_space<vmem>>, vector<1x128xf32>
    %11 = vector.broadcast %10 : vector<1x128xf32> to vector<128x128xf32>
    %12 = arith.addf %9, %11 : vector<128x128xf32>
    %cst_11 = arith.constant dense<0xFF800000> : vector<128xf32>
    %13 = vector.multi_reduction <maximumf>, %12, %cst_11 [1] : vector<128x128xf32> to vector<128xf32>
    %14 = vector.shape_cast %13 : vector<128xf32> to vector<128x1xf32>
    %15 = vector.broadcast %14 : vector<128x1xf32> to vector<128x128xf32>
    %16 = arith.subf %12, %15 : vector<128x128xf32>
    %17 = math.exp %16 : vector<128x128xf32>
    %cst_12 = arith.constant dense<0.000000e+00> : vector<128xf32>
    %18 = vector.multi_reduction <add>, %17, %cst_12 [1] : vector<128x128xf32> to vector<128xf32>
    %19 = vector.shape_cast %18 : vector<128xf32> to vector<128x1xf32>
    %20 = vector.broadcast %19 : vector<128x1xf32> to vector<128x128xf32>
    %21 = arith.divf %17, %20 : vector<128x128xf32>
    %22 = tpu.transpose %21, [1, 0] : vector<128x128xf32> -> vector<128x128xf32>
    %23 = vector.extract_strided_slice %22 {offsets = [0, 0], sizes = [4, 128], strides = [1, 1]} : vector<128x128xf32> to vector<4x128xf32>
    %c0_13 = arith.constant 0 : index
    %c0_14 = arith.constant 0 : index
    %24 = vector.load %arg6[%c0_13, %c0_14] : memref<4x128xf32, #tpu.memory_space<vmem>>, vector<4x128xf32>
    tpu.vector_store %arg6[%c0_13, %c0_14], %23 {strides = array<i32>} : memref<4x128xf32, #tpu.memory_space<vmem>>, vector<4x128xf32>,
    return
  }
  func.func @transform_0(%arg0: i32) -> (i32, i32) {
    %c0_i32 = arith.constant 0 : i32
    %c0_i32_0 = arith.constant 0 : i32
    return %arg0, %c0_i32 : i32, i32
  }
  func.func @transform_1(%arg0: i32) -> (i32, i32) {
    %c0_i32 = arith.constant 0 : i32
    %c0_i32_0 = arith.constant 0 : i32
    %c0_i32_1 = arith.constant 0 : i32
    return %c0_i32, %c0_i32_0 : i32, i32
  }
  func.func @transform_2(%arg0: i32) -> (i32, i32) {
    %c0_i32 = arith.constant 0 : i32
    %c0_i32_0 = arith.constant 0 : i32
    %c0_i32_1 = arith.constant 0 : i32
    return %c0_i32, %c0_i32_0 : i32, i32
  }
  func.func @transform_3(%arg0: i32) -> (i32, i32) {
    %c0_i32 = arith.constant 0 : i32
    %c0_i32_0 = arith.constant 0 : i32
    %c0_i32_1 = arith.constant 0 : i32
    return %c0_i32, %c0_i32_0 : i32, i32
  }
  func.func @transform_4(%arg0: i32) -> (i32, i32) {
    %c0_i32 = arith.constant 0 : i32
    %c0_i32_0 = arith.constant 0 : i32
    %c0_i32_1 = arith.constant 0 : i32
    return %c0_i32, %c0_i32_0 : i32, i32
  }
  func.func @transform_5(%arg0: i32) -> (i32, i32) {
    %c0_i32 = arith.constant 0 : i32
    %c0_i32_0 = arith.constant 0 : i32
    return %c0_i32, %arg0 : i32, i32
  }
}

</mosaic_0001>

<bundles_post_ra>
// kernel: net_forward.1
= control target key start
LH: loop header
LB: loop body
LE: loop exit
PB: predicated region body
PF: predicated region fallthrough
CT: control target
= control target key end

     0   :  { %10 = vsyncpa [#allocation3], 0  ;;  %s1537_s0 = inlined_call_operand.vmem [shape: f32[256,16], index: 0, kind: input, shape index: {}]   ;;  %s1538_s1 = inlined_call_operand.vmem [shape: f32[16,32], index: 1, kind: input, shape index: {}]   ;;  %s1539_s2 = inlined_call_operand.vmem [shape: f32[1,32], index: 2, kind: input, shape index: {}]   ;;  %s1540_s3 = inlined_call_operand.vmem [shape: f32[32,128], index: 3, kind: input, shape index: {}]   ;;  %s1541_s4 = inlined_call_operand.vmem [shape: f32[1,128], index: 4, kind: input, shape index: {}]   ;;  %s1542_s5 = inlined_call_operand.hbm [shape: f32[4,256], index: 5, kind: output, shape index: {}]  }
   0x1   :  { %12 = vsyncpa [#allocation3 + $0x1], 0  ;;  %s1268_s18 = smov 0   ;;  %s1270_s19 = smov 0  }
   0x2   :  { %s1272_s20 = smov 0   ;;  %s1274_s21 = smov 0  }
   0x3 LB: > { %s1289_s22 = sadd.s32 4294967295, %s1235_s21   ;;  %s915_s23 = sadd.s32 4294967294, %s1235_s21   ;;  %s1235_s21 = sphi %s1274_s21, %s1548_s21   ;;  %s1231_s20 = sphi %s1272_s20, %s1547_s20   ;;  %s1227_s19 = sphi %s1270_s19, %s1546_s19   ;;  %s1223_s18 = sphi %s1268_s18, %s1545_s18  }
   0x4   : > { %s1293_s24 = sadd.s32 1, %s1235_s21   ;;  %s135_s25 = sadd.s32 1, %s1231_s20 }
   0x5   : > { %s132_s26 = ssub.s32 %s1235_s21, %s1293_s24  ;;  %p145_p0 = scmp.ne.s32.totalorder %s1231_s20, %s1227_s19 }
   0x6   : > { %p133_p1 = scmp.eq.s32.totalorder %s132_s26, 0  ;;  %p146_p2 = scmp.eq.s32.totalorder %s1289_s22, 1 }
   0x7   : > { %p151_p3 = scmp.ne.s32.totalorder %s1227_s19, %s1223_s18  ;;  %p152_p4 = scmp.eq.s32.totalorder %s915_s23, 1 }
   0x8   : > { %s1304_s27 = scalar_select %p133_p1, %s1231_s20, %s135_s25  }
   0x9   : > { %p1306_p5 = por %p146_p2, %p145_p0  ;;  %p1310_p6 = por %p152_p4, %p151_p3 }
   0xa   : > { %p918_p7 = scmp.ge.s32.totalorder %s1235_s21, 1  ;;  %p191_p8 = scmp.lt.s32.totalorder %s1235_s21, 3 }
   0xc   : > { %p192_p9 = pnand %p918_p7, %p191_p8 }
   0xd   : > { %v241_v0 = vld [vmem:[%s1538_s1] sm:$0xff] (!%p192_p9)  ;;  %v242_v1 = vld [vmem:[%s1538_s1 + $0x8] sm:$0xff] (!%p192_p9)  ;;  %s920_s9 = sshll.u32 (!%p192_p9), %s1289_s22, 4  ;;  %vm250_vm0 = vcmask (!%p192_p9), 130048   ;;  %v462_v22 = vld [vmem:[%s1540_s3 + $0x10] sm:$0xff] (!%p192_p9)  ;;  %vm471_vm1 = vcmask (!%p192_p9), 261120  }
   0xe   : > { %195 = sbr.rel (%p192_p9) target bundleno = 915 (0x393), region = 40  ;;  %v460_v2 = vld [vmem:[%s1540_s3] sm:$0xff] (!%p192_p9)  ;;  %v1058_v3 = vpack.c.bf16 (!%p192_p9), %v242_v1, %v241_v0  ;;  %p220_p10 = scmp.lt.s32.totalorder (!%p192_p9), %s920_s9, 31  ;;  %v461_v4 = vld [vmem:[%s1540_s3 + $0x8] sm:$0xff] (!%p192_p9)  ;;  %v463_v23 = vld [vmem:[%s1540_s3 + $0x18] sm:$0xff] (!%p192_p9) }
   0xf   : > { %v1062_v5 = vpack.c.bf16 (!%p192_p9), %v461_v4, %v460_v2  ;;  %v1066_v24 = vpack.c.bf16 (!%p192_p9), %v463_v23, %v462_v22  ;;  %v922_v25 = vld [vmem:[%s1539_s2] ss:$0 sm:$0xff] (!%p192_p9)  ;;  %s216_s10 = sand.u32 (!%p192_p9), 1, %s1227_s19   ;;  %s1237_s26 = smov (!%p192_p9), [#allocation2]  }
  0x10   : > { %1059 = vmatprep.subr.bf16.mxu0 (!%p192_p9), %v1058_v3  ;;  %s919_s11 = sshll.u32 (!%p192_p9), %s216_s10, 2  ;;  %s843_s23 = scalar_lea.sflag (!%p192_p9), [#allocation3], %s216_s10 }
  0x11   : > { %1061 = vmatpush3.bf16.msra.mxu0 (!%p192_p9), %v1058_v3  ;;  %1063 = vmatprep.subr.bf16.mxu1 (!%p192_p9), %v1062_v5  ;;  %s218_s12 = scalar_lea.vmem (!%p192_p9), [#allocation2], %s919_s11 }
  0x12   : > { %1065 = vmatpush3.bf16.msra.mxu1 (!%p192_p9), %v1062_v5  ;;  %s856_s13 = sshll.u32 (!%p192_p9), %s218_s12, 4  ;;  %s1492_s13 = int_to_ptr.vmem [resolvable:$true] %s856_s13 }
  0x13   : > { %1067 = vmatprep.subr.bf16.mxu1 (!%p192_p9), %v1066_v24  ;;  %s1173_s25 = scalar_lea.vmem (!%p192_p9), %s1492_s13, 64 }
  0x14   : > { %p1174_p11 = scmp.ne.s32.totalorder (!%p192_p9), %s1492_s13, %s1173_s25 }
  0x15   : > { %s1550_s9 = smov (!%p220_p10, %s920_s9), 31 }
  0x16   : > { %s921_s14 = sshll.u32 %s1550_s9, 3  ;;  %1069 = vmatpush3.bf16.msra.mxu1 %v1066_v24  ;;  %p1175_p12 = pnand %p1174_p11, %p1306_p5 }
  0x17   : > { %s1332_s17 = scalar_lea.vmem %s1537_s0, %s921_s14  ;;  %s957_s14 = sshll.u32 %s1289_s22, 6 }
  0x18   : > { %v225_v6 = vld [vmem:[%s1332_s17] sm:$0xff]  ;;  %v226_v7 = vld [vmem:[%s1332_s17 + $0x8] sm:$0xff]  ;;  %v227_v8 = vld [vmem:[%s1332_s17 + $0x10] sm:$0xff]  ;;  %p1176_p13 = pneg %p1175_p12  ;;  %s1177_s22 = sshll.u32 %s1237_s26, 4  ;;  %s1178_s22 = int_to_ptr.vmem [resolvable:$false] %s1177_s22 }
  0x19   : > { %1002 = vmatprep.mubr.msk.f32.mxu0 %vm250_vm0, %v225_v6  ;;  %v228_v9 = vld [vmem:[%s1332_s17 + $0x18] sm:$0xff]  ;;  %v229_v10 = vld [vmem:[%s1332_s17 + $0x20] sm:$0xff]  ;;  %v230_v11 = vld [vmem:[%s1332_s17 + $0x28] sm:$0xff]  ;;  %s1179_s30 = scalar_lea.vmem %s1178_s22, 128  ;;  %p1180_p0 = scmp.lt.s32.totalorder %s1492_s13, %s1178_s22 }
  0x1a   : > { %1003 = vmatmul.mubr.msk.f32.vlgmr.msra.gmra.mrb[0].mxu0 %vm250_vm0, %v226_v7  ;;  %v231_v12 = vld [vmem:[%s1332_s17 + $0x30] sm:$0xff]  ;;  %v232_v13 = vld [vmem:[%s1332_s17 + $0x38] sm:$0xff]  ;;  %v233_v14 = vld [vmem:[%s1332_s17 + $0x40] sm:$0xff]  ;;  %p1181_p1 = scmp.lt.s32.totalorder %s1179_s30, %s1173_s25 }
  0x1b   : > { %1005 = vmatprep.mubr.msk.f32.mxu0 %vm250_vm0, %v227_v8  ;;  %v234_v15 = vld [vmem:[%s1332_s17 + $0x48] sm:$0xff]  ;;  %v235_v16 = vld [vmem:[%s1332_s17 + $0x50] sm:$0xff]  ;;  %v236_v17 = vld [vmem:[%s1332_s17 + $0x58] sm:$0xff] }
  0x1c   : > { %v237_v18 = vld [vmem:[%s1332_s17 + $0x60] sm:$0xff]  ;;  %v238_v19 = vld [vmem:[%s1332_s17 + $0x68] sm:$0xff]  ;;  %v239_v20 = vld [vmem:[%s1332_s17 + $0x70] sm:$0xff]  ;;  %p1182_p2 = por %p1181_p1, %p1180_p0 }
  0x1d   : > { %v240_v21 = vld [vmem:[%s1332_s17 + $0x78] sm:$0xff]  ;;  %s1497_s17 = scalar_lea.hbm %s1542_s5, %s957_s14 }
  0x1e   : > { %1006 = vmatmul.mubr.msk.f32.gmra.mrb[2].mxu0 %vm250_vm0, %v228_v9  ;;  %p1183_p3 = pnand %p1182_p2, %p1176_p13 }
  0x1f   : > { %1008 = vmatprep.mubr.msk.f32.mxu0 %vm250_vm0, %v229_v10  ;;  %v939_v10 = vld [vmem:[%s1541_s4] ss:$0 sm:$0xff] }
  0x22   : > { %1009 = vmatmul.mubr.msk.f32.gmra.mrb[4].mxu0 %vm250_vm0, %v230_v11 }
  0x23   : > { %1011 = vmatprep.mubr.msk.f32.mxu0 %vm250_vm0, %v231_v12 }
  0x26   : > { %1012 = vmatmul.mubr.msk.f32.gmra.mrb[6].mxu0 %vm250_vm0, %v232_v13 }
  0x27   : > { %1014 = vmatprep.mubr.msk.f32.mxu0 %vm250_vm0, %v233_v14 }
  0x2a   : > { %1015 = vmatmul.mubr.msk.f32.gmra.mrb[8].mxu0 %vm250_vm0, %v234_v15 }
  0x2b   : > { %1017 = vmatprep.mubr.msk.f32.mxu0 %vm250_vm0, %v235_v16 }
  0x2e   : > { %1018 = vmatmul.mubr.msk.f32.gmra.mrb[10].mxu0 %vm250_vm0, %v236_v17 }
  0x2f   : > { %1020 = vmatprep.mubr.msk.f32.mxu0 %vm250_vm0, %v237_v18 }
  0x32   : > { %1021 = vmatmul.mubr.msk.f32.gmra.mrb[12].mxu0 %vm250_vm0, %v238_v19 }
  0x33   : > { %1023 = vmatprep.mubr.msk.f32.mxu0 %vm250_vm0, %v239_v20 }
  0x36   : > { %1024 = vmatmul.mubr.msk.f32.gmra.mrb[14].mxu0 %vm250_vm0, %v240_v21 }
  0xed   : > { %v1004_v26 = vpop.f32.mrb[0].mxu0 }
  0xee   : > { %v371_v27 = vadd.f32 %v1004_v26, %v922_v25  ;;  %v365_v28 = vpop.f32.mrb[1].mxu0 }
  0xef   : > { %v366_v29 = vadd.f32 %v922_v25, %v365_v28 }
  0xf0   : > { %v445_v32 = vmax.f32 %v371_v27, 0.0 }
  0xf1   : > { %v444_v30 = vmax.f32 %v366_v29, 0.0  ;;  %v1007_v31 = vpop.f32.mrb[2].mxu0 }
  0xf2   : > { %v381_v33 = vadd.f32 %v1007_v31, %v922_v25  ;;  %v375_v34 = vpop.f32.mrb[3].mxu0 }
  0xf3   : > { %v376_v35 = vadd.f32 %v922_v25, %v375_v34  ;;  %1034 = vmatprep.mubr.msk.f32.mxu1 %vm471_vm1, %v444_v30 }
  0xf4   : > { %v447_v36 = vmax.f32 %v381_v33, 0.0  ;;  %1035 = vmatmul.mubr.msk.f32.vlgmr.msra.gmra.mrb[0].mxu1 %vm471_vm1, %v445_v32 }
  0xf5   : > { %v446_v37 = vmax.f32 %v376_v35, 0.0  ;;  %v1010_v38 = vpop.f32.mrb[4].mxu0 }
  0xf6   : > { %v391_v39 = vadd.f32 %v1010_v38, %v922_v25  ;;  %v385_v40 = vpop.f32.mrb[5].mxu0 }
  0xf7   : > { %v386_v41 = vadd.f32 %v922_v25, %v385_v40  ;;  %1037 = vmatprep.mubr.msk.f32.mxu1 %vm471_vm1, %v446_v37 }
  0xf8   : > { %v449_v42 = vmax.f32 %v391_v39, 0.0  ;;  %1038 = vmatmul.mubr.msk.f32.gmra.mrb[2].mxu1 %vm471_vm1, %v447_v36 }
  0xf9   : > { %v448_v43 = vmax.f32 %v386_v41, 0.0  ;;  %v1013_v44 = vpop.f32.mrb[6].mxu0 }
  0xfa   : > { %v401_v45 = vadd.f32 %v1013_v44, %v922_v25  ;;  %v395_v46 = vpop.f32.mrb[7].mxu0 }
  0xfb   : > { %v396_v47 = vadd.f32 %v922_v25, %v395_v46  ;;  %1040 = vmatprep.mubr.msk.f32.mxu1 %vm471_vm1, %v448_v43 }
  0xfc   : > { %v451_v48 = vmax.f32 %v401_v45, 0.0  ;;  %1041 = vmatmul.mubr.msk.f32.gmra.mrb[4].mxu1 %vm471_vm1, %v449_v42 }
  0xfd   : > { %v450_v49 = vmax.f32 %v396_v47, 0.0  ;;  %v1016_v50 = vpop.f32.mrb[8].mxu0 }
  0xfe   : > { %v411_v51 = vadd.f32 %v1016_v50, %v922_v25  ;;  %v405_v52 = vpop.f32.mrb[9].mxu0 }
  0xff   : > { %v406_v53 = vadd.f32 %v922_v25, %v405_v52  ;;  %1043 = vmatprep.mubr.msk.f32.mxu1 %vm471_vm1, %v450_v49 }
 0x100   : > { %v453_v54 = vmax.f32 %v411_v51, 0.0  ;;  %1044 = vmatmul.mubr.msk.f32.gmra.mrb[6].mxu1 %vm471_vm1, %v451_v48 }
 0x101   : > { %v452_v55 = vmax.f32 %v406_v53, 0.0  ;;  %v1019_v56 = vpop.f32.mrb[10].mxu0 }
 0x102   : > { %v421_v57 = vadd.f32 %v1019_v56, %v922_v25  ;;  %v415_v58 = vpop.f32.mrb[11].mxu0 }
 0x103   : > { %v416_v59 = vadd.f32 %v922_v25, %v415_v58  ;;  %1046 = vmatprep.mubr.msk.f32.mxu1 %vm471_vm1, %v452_v55 }
 0x104   : > { %v455_v60 = vmax.f32 %v421_v57, 0.0  ;;  %1047 = vmatmul.mubr.msk.f32.gmra.mrb[8].mxu1 %vm471_vm1, %v453_v54 }
 0x105   : > { %v454_v61 = vmax.f32 %v416_v59, 0.0  ;;  %v1022_v62 = vpop.f32.mrb[12].mxu0 }
 0x106   : > { %v431_v63 = vadd.f32 %v1022_v62, %v922_v25  ;;  %v425_v0 = vpop.f32.mrb[13].mxu0 }
 0x107   : > { %v426_v1 = vadd.f32 %v922_v25, %v425_v0  ;;  %1049 = vmatprep.mubr.msk.f32.mxu1 %vm471_vm1, %v454_v61 }
 0x108   : > { %v457_v2 = vmax.f32 %v431_v63, 0.0  ;;  %1050 = vmatmul.mubr.msk.f32.gmra.mrb[10].mxu1 %vm471_vm1, %v455_v60 }
 0x109   : > { %v456_v3 = vmax.f32 %v426_v1, 0.0  ;;  %v1025_v4 = vpop.f32.mrb[14].mxu0 }
 0x10a   : > { %v441_v5 = vadd.f32 %v1025_v4, %v922_v25  ;;  %v435_v6 = vpop.f32.mrb[15].mxu0 }
 0x10b   : > { %v436_v7 = vadd.f32 %v922_v25, %v435_v6  ;;  %1052 = vmatprep.mubr.msk.f32.mxu1 %vm471_vm1, %v456_v3 }
 0x10c   : > { %v459_v8 = vmax.f32 %v441_v5, 0.0  ;;  %1053 = vmatmul.mubr.msk.f32.gmra.mrb[12].mxu1 %vm471_vm1, %v457_v2 }
 0x10d   : > { %v458_v9 = vmax.f32 %v436_v7, 0.0 }
 0x10f   : > { %1055 = vmatprep.mubr.msk.f32.mxu1 %vm471_vm1, %v458_v9 }
 0x110   : > { %1056 = vmatmul.mubr.msk.f32.gmra.mrb[14].mxu1 %vm471_vm1, %v459_v8 }
 0x1c7   : > { %v1036_v11 = vpop.f32.mrb[0].mxu1 }
 0x1c8   : > { %v586_v12 = vpop.f32.mrb[1].mxu1  ;;  %v592_v16 = vadd.f32 %v1036_v11, %v939_v10 }
 0x1c9   : > { %v587_v13 = vadd.f32 %v939_v10, %v586_v12 }
 0x1cb   : > { %v1039_v14 = vpop.f32.mrb[2].mxu1  ;;  %665 = vmax.xlane.f32.xlu0 %v587_v13 }
 0x1cc   : > { %v596_v15 = vpop.f32.mrb[3].mxu1  ;;  %v602_v20 = vadd.f32 %v1039_v14, %v939_v10 }
 0x1cd   : > { %v597_v17 = vadd.f32 %v939_v10, %v596_v15 }
 0x1cf   : > { %v1042_v18 = vpop.f32.mrb[4].mxu1  ;;  %669 = vmax.xlane.f32.xlu1 %v597_v17  ;;  %667 = vmax.xlane.f32.xlu0 %v592_v16 }
 0x1d0   : > { %v606_v19 = vpop.f32.mrb[5].mxu1  ;;  %v612_v22 = vadd.f32 %v1042_v18, %v939_v10 }
 0x1d1   : > { %v607_v21 = vadd.f32 %v939_v10, %v606_v19 }
 0x1d3   : > { %v1045_v23 = vpop.f32.mrb[6].mxu1  ;;  %671 = vmax.xlane.f32.xlu1 %v602_v20  ;;  %673 = vmax.xlane.f32.xlu0 %v607_v21 }
 0x1d4   : > { %v616_v24 = vpop.f32.mrb[7].mxu1  ;;  %v1394_v26 = vadd.f32 %v1045_v23, %v939_v10 }
 0x1d5   : > { %v617_v25 = vadd.f32 %v939_v10, %v616_v24 }
 0x1d7   : > { %v1048_v27 = vpop.f32.mrb[8].mxu1  ;;  %675 = vmax.xlane.f32.xlu1 %v612_v22  ;;  %677 = vmax.xlane.f32.xlu0 %v617_v25 }
 0x1d8   : > { %v626_v28 = vpop.f32.mrb[9].mxu1  ;;  %v1396_v30 = vadd.f32 %v1048_v27, %v939_v10 }
 0x1d9   : > { %v627_v29 = vadd.f32 %v939_v10, %v626_v28 }
 0x1db   : > { %v1051_v31 = vpop.f32.mrb[10].mxu1  ;;  %679 = vmax.xlane.f32.xlu1 %v1394_v26  ;;  %681 = vmax.xlane.f32.xlu0 %v627_v29 }
 0x1dc   : > { %v636_v32 = vpop.f32.mrb[11].mxu1  ;;  %v1401_v34 = vadd.f32 %v1051_v31, %v939_v10 }
 0x1dd   : > { %v1399_v33 = vadd.f32 %v939_v10, %v636_v32 }
 0x1df   : > { %v1054_v35 = vpop.f32.mrb[12].mxu1  ;;  %683 = vmax.xlane.f32.xlu1 %v1396_v30  ;;  %685 = vmax.xlane.f32.xlu0 %v1399_v33 }
 0x1e0   : > { %v646_v36 = vpop.f32.mrb[13].mxu1  ;;  %v1407_v38 = vadd.f32 %v1054_v35, %v939_v10 }
 0x1e1   : > { %v1405_v37 = vadd.f32 %v939_v10, %v646_v36 }
 0x1e3   : > { %v1057_v39 = vpop.f32.mrb[14].mxu1  ;;  %687 = vmax.xlane.f32.xlu1 %v1401_v34  ;;  %689 = vmax.xlane.f32.xlu0 %v1405_v37 }
 0x1e4   : > { %v656_v40 = vpop.f32.mrb[15].mxu1  ;;  %v1413_v42 = vadd.f32 %v1057_v39, %v939_v10 }
 0x1e5   : > { %v1411_v41 = vadd.f32 %v939_v10, %v656_v40 }
 0x1e7   : > { %691 = vmax.xlane.f32.xlu1 %v1407_v38  ;;  %693 = vmax.xlane.f32.xlu0 %v1411_v41 }
 0x1eb   : > { %695 = vmax.xlane.f32.xlu1 %v1413_v42 }
 0x258   : > { %v666_v43 = vpop.xlane.xlu0 %665 }
 0x259   : > { %v697_v44 = vsub.f32 %v587_v13, %v666_v43 }
 0x25b   : > { %v713_v45 = vmul.f32 1.442695, %v697_v44 }
 0x25c   : > { %v670_v46 = vpop.xlane.xlu1 %669  ;;  %v668_v47 = vpop.xlane.xlu0 %667 }
 0x25d   : > { %1109 = vpow2.f32 %v713_v45  ;;  %v699_v48 = vsub.f32 %v597_v17, %v670_v46  ;;  %v698_v49 = vsub.f32 %v592_v16, %v668_v47 }
 0x25f   : > { %v717_v50 = vmul.f32 1.442695, %v699_v48  ;;  %v715_v51 = vmul.f32 1.442695, %v698_v49 }
 0x260   : > { %v672_v52 = vpop.xlane.xlu1 %671  ;;  %v674_v53 = vpop.xlane.xlu0 %673 }
 0x261   : > { %1111 = vpow2.f32 %v717_v50  ;;  %v700_v54 = vsub.f32 %v602_v20, %v672_v52  ;;  %v701_v55 = vsub.f32 %v607_v21, %v674_v53 }
 0x262   : > { %1113 = vpow2.f32 %v715_v51 }
 0x263   : > { %v719_v56 = vmul.f32 1.442695, %v700_v54  ;;  %v721_v57 = vmul.f32 1.442695, %v701_v55 }
 0x264   : > { %v676_v58 = vpop.xlane.xlu1 %675  ;;  %v678_v59 = vpop.xlane.xlu0 %677 }
 0x265   : > { %1115 = vpow2.f32 %v719_v56  ;;  %v702_v60 = vsub.f32 %v612_v22, %v676_v58  ;;  %v703_v61 = vsub.f32 %v617_v25, %v678_v59 }
 0x266   : > { %1117 = vpow2.f32 %v721_v57 }
 0x267   : > { %v1418_v62 = vpop.eup %1109  ;;  %v723_v63 = vmul.f32 1.442695, %v702_v60  ;;  %v725_v0 = vmul.f32 1.442695, %v703_v61 }
 0x268   : > { %v680_v1 = vpop.xlane.xlu1 %679  ;;  %745 = vadd.xlane.f32.xlu0 %v1418_v62  ;;  %v682_v2 = vpop.xlane.xlu0 %681 }
 0x269   : > { %1119 = vpow2.f32 %v723_v63  ;;  %v704_v3 = vsub.f32 %v1394_v26, %v680_v1  ;;  %v705_v4 = vsub.f32 %v627_v29, %v682_v2 }
 0x26a   : > { %1121 = vpow2.f32 %v725_v0 }
 0x26b   : > { %v1422_v5 = vpop.eup %1111  ;;  %v727_v6 = vmul.f32 1.442695, %v704_v3  ;;  %v729_v7 = vmul.f32 1.442695, %v705_v4 }
 0x26c   : > { %v1424_v8 = vpop.eup %1113  ;;  %v684_v9 = vpop.xlane.xlu1 %683  ;;  %749 = vadd.xlane.f32.xlu0 %v1422_v5 }
 0x26d   : > { %v686_v10 = vpop.xlane.xlu0 %685  ;;  %1123 = vpow2.f32 %v727_v6  ;;  %v706_v11 = vsub.f32 %v1396_v30, %v684_v9  ;;  %747 = vadd.xlane.f32.xlu1 %v1424_v8 }
 0x26e   : > { %v707_v12 = vsub.f32 %v1399_v33, %v686_v10  ;;  %1125 = vpow2.f32 %v729_v7 }
 0x26f   : > { %v1430_v13 = vpop.eup %1115  ;;  %v731_v14 = vmul.f32 1.442695, %v706_v11 }
 0x270   : > { %v733_v15 = vmul.f32 1.442695, %v707_v12  ;;  %v1432_v16 = vpop.eup %1117  ;;  %v688_v17 = vpop.xlane.xlu1 %687 }
 0x271   : > { %v690_v18 = vpop.xlane.xlu0 %689  ;;  %1127 = vpow2.f32 %v731_v14  ;;  %v708_v19 = vsub.f32 %v1401_v34, %v688_v17  ;;  %751 = vadd.xlane.f32.xlu1 %v1430_v13  ;;  %753 = vadd.xlane.f32.xlu0 %v1432_v16 }
 0x272   : > { %v709_v20 = vsub.f32 %v1405_v37, %v690_v18  ;;  %1129 = vpow2.f32 %v733_v15 }
 0x273   : > { %v1438_v21 = vpop.eup %1119  ;;  %v735_v22 = vmul.f32 1.442695, %v708_v19 }
 0x274   : > { %v737_v23 = vmul.f32 1.442695, %v709_v20  ;;  %v1440_v24 = vpop.eup %1121  ;;  %v692_v25 = vpop.xlane.xlu1 %691 }
 0x275   : > { %v694_v26 = vpop.xlane.xlu0 %693  ;;  %1131 = vpow2.f32 %v735_v22  ;;  %v710_v27 = vsub.f32 %v1407_v38, %v692_v25  ;;  %755 = vadd.xlane.f32.xlu1 %v1438_v21  ;;  %757 = vadd.xlane.f32.xlu0 %v1440_v24 }
 0x276   : > { %v711_v28 = vsub.f32 %v1411_v41, %v694_v26  ;;  %1133 = vpow2.f32 %v737_v23 }
 0x277   : > { %v1446_v29 = vpop.eup %1123  ;;  %v739_v30 = vmul.f32 1.442695, %v710_v27 }
 0x278   : > { %v741_v31 = vmul.f32 1.442695, %v711_v28  ;;  %v1448_v32 = vpop.eup %1125  ;;  %v696_v33 = vpop.xlane.xlu1 %695 }
 0x279   : > { %1135 = vpow2.f32 %v739_v30  ;;  %v712_v34 = vsub.f32 %v1413_v42, %v696_v33  ;;  %759 = vadd.xlane.f32.xlu1 %v1446_v29  ;;  %761 = vadd.xlane.f32.xlu0 %v1448_v32 }
 0x27a   : > { %1137 = vpow2.f32 %v741_v31 }
 0x27b   : > { %v1453_v35 = vpop.eup %1127  ;;  %v743_v36 = vmul.f32 1.442695, %v712_v34 }
 0x27c   : > { %v1455_v37 = vpop.eup %1129 }
 0x27d   : > { %1139 = vpow2.f32 %v743_v36  ;;  %763 = vadd.xlane.f32.xlu1 %v1453_v35  ;;  %765 = vadd.xlane.f32.xlu0 %v1455_v37 }
 0x27f   : > { %v1459_v38 = vpop.eup %1131 }
 0x280   : > { %v1461_v39 = vpop.eup %1133 }
 0x281   : > { %767 = vadd.xlane.f32.xlu1 %v1459_v38  ;;  %769 = vadd.xlane.f32.xlu0 %v1461_v39 }
 0x283   : > { %v1465_v40 = vpop.eup %1135 }
 0x284   : > { %v1467_v41 = vpop.eup %1137 }
 0x285   : > { %771 = vadd.xlane.f32.xlu1 %v1465_v40  ;;  %773 = vadd.xlane.f32.xlu0 %v1467_v41 }
 0x287   : > { %v1471_v42 = vpop.eup %1139 }
 0x289   : > { %775 = vadd.xlane.f32.xlu1 %v1471_v42 }
 0x2f5   : > { %v746_v43 = vpop.xlane.xlu0 %745 }
 0x2f6   : > { %1141 = vrcp.f32 %v746_v43 }
 0x2f9   : > { %v750_v45 = vpop.xlane.xlu0 %749 }
 0x2fa   : > { %v748_v44 = vpop.xlane.xlu1 %747 }
 0x2fb   : > { %1143 = vrcp.f32 %v748_v44 }
 0x2fc   : > { %1145 = vrcp.f32 %v750_v45 }
 0x2fe   : > { %v752_v46 = vpop.xlane.xlu1 %751  ;;  %v754_v49 = vpop.xlane.xlu0 %753 }
 0x2ff   : > { %1147 = vrcp.f32 %v752_v46 }
 0x300   : > { %v1142_v47 = vpop.eup %1141  ;;  %1149 = vrcp.f32 %v754_v49 }
 0x301   : > { %v778_v48 = vmul.f32 %v1142_v47, %v1418_v62 }
 0x302   : > { %v756_v51 = vpop.xlane.xlu1 %755  ;;  %v758_v54 = vpop.xlane.xlu0 %757 }
 0x303   : > { %809 = vxpose.xlu0.b32.start [1/16] (narrow) %v778_v48, 8  ;;  %1151 = vrcp.f32 %v756_v51 }
 0x304   : > { %1153 = vrcp.f32 %v758_v54 }
 0x305   : > { %v1144_v50 = vpop.eup %1143 }
 0x306   : > { %v780_v52 = vmul.f32 %v1144_v50, %v1424_v8  ;;  %v1146_v53 = vpop.eup %1145  ;;  %v760_v57 = vpop.xlane.xlu1 %759 }
 0x307   : > { %v782_v55 = vmul.f32 %v1146_v53, %v1422_v5  ;;  %1155 = vrcp.f32 %v760_v57  ;;  %v762_v60 = vpop.xlane.xlu0 %761 }
 0x308   : > { %810 = vxpose.xlu0.b32.cont [2/16] (narrow) %v780_v52, 8  ;;  %1157 = vrcp.f32 %v762_v60 }
 0x309   : > { %v1148_v56 = vpop.eup %1147 }
 0x30a   : > { %v784_v58 = vmul.f32 %v1148_v56, %v1430_v13  ;;  %v1150_v59 = vpop.eup %1149  ;;  %v764_v63 = vpop.xlane.xlu1 %763 }
 0x30b   : > { %v786_v61 = vmul.f32 %v1150_v59, %v1432_v16  ;;  %1159 = vrcp.f32 %v764_v63  ;;  %v766_v2 = vpop.xlane.xlu0 %765 }
 0x30c   : > { %811 = vxpose.xlu0.b32.cont [3/16] (narrow) %v782_v55, 8  ;;  %1161 = vrcp.f32 %v766_v2 }
 0x30d   : > { %v1152_v62 = vpop.eup %1151 }
 0x30e   : > { %v788_v0 = vmul.f32 %v1152_v62, %v1438_v21  ;;  %v1154_v1 = vpop.eup %1153  ;;  %v768_v5 = vpop.xlane.xlu1 %767 }
 0x30f   : > { %v790_v3 = vmul.f32 %v1154_v1, %v1440_v24  ;;  %1163 = vrcp.f32 %v768_v5  ;;  %v770_v8 = vpop.xlane.xlu0 %769 }
 0x310   : > { %812 = vxpose.xlu0.b32.cont [4/16] (narrow) %v784_v58, 8  ;;  %1165 = vrcp.f32 %v770_v8 }
 0x311   : > { %v1156_v4 = vpop.eup %1155 }
 0x312   : > { %v792_v6 = vmul.f32 %v1156_v4, %v1446_v29  ;;  %v1158_v7 = vpop.eup %1157  ;;  %v772_v11 = vpop.xlane.xlu1 %771 }
 0x313   : > { %v794_v9 = vmul.f32 %v1158_v7, %v1448_v32  ;;  %1167 = vrcp.f32 %v772_v11  ;;  %v774_v14 = vpop.xlane.xlu0 %773 }
 0x314   : > { %813 = vxpose.xlu0.b32.cont [5/16] (narrow) %v786_v61, 8  ;;  %1169 = vrcp.f32 %v774_v14 }
 0x315   : > { %v1160_v10 = vpop.eup %1159 }
 0x316   : > { %v796_v12 = vmul.f32 %v1160_v10, %v1453_v35  ;;  %v1162_v13 = vpop.eup %1161  ;;  %v776_v17 = vpop.xlane.xlu1 %775 }
 0x317   : > { %v798_v15 = vmul.f32 %v1162_v13, %v1455_v37  ;;  %1171 = vrcp.f32 %v776_v17 }
 0x318   : > { %814 = vxpose.xlu0.b32.cont [6/16] (narrow) %v788_v0, 8 }
 0x319   : > { %v1164_v16 = vpop.eup %1163 }
 0x31a   : > { %v800_v18 = vmul.f32 %v1164_v16, %v1459_v38  ;;  %v1166_v19 = vpop.eup %1165 }
 0x31b   : > { %v802_v20 = vmul.f32 %v1166_v19, %v1461_v39 }
 0x31c   : > { %815 = vxpose.xlu0.b32.cont [7/16] (narrow) %v790_v3, 8 }
 0x31d   : > { %v1168_v21 = vpop.eup %1167 }
 0x31e   : > { %v804_v22 = vmul.f32 %v1168_v21, %v1465_v40  ;;  %v1170_v23 = vpop.eup %1169 }
 0x31f   : > { %v806_v24 = vmul.f32 %v1170_v23, %v1467_v41 }
 0x320   : > { %816 = vxpose.xlu0.b32.cont [8/16] (narrow) %v792_v6, 8 }
 0x321   : > { %v1172_v25 = vpop.eup %1171 }
 0x322   : > { %v808_v26 = vmul.f32 %v1172_v25, %v1471_v42 }
 0x324   : > { %817 = vxpose.xlu0.b32.cont [9/16] (narrow) %v794_v9, 8 }
 0x328   : > { %818 = vxpose.xlu0.b32.cont [10/16] (narrow) %v796_v12, 8 }
 0x32c   : > { %819 = vxpose.xlu0.b32.cont [11/16] (narrow) %v798_v15, 8 }
 0x330   : > { %820 = vxpose.xlu0.b32.cont [12/16] (narrow) %v800_v18, 8 }
 0x334   : > { %821 = vxpose.xlu0.b32.cont [13/16] (narrow) %v802_v20, 8 }
 0x338   : > { %822 = vxpose.xlu0.b32.cont [14/16] (narrow) %v804_v22, 8 }
 0x33c   : > { %823 = vxpose.xlu0.b32.cont [15/16] (narrow) %v806_v24, 8 }
 0x340   : > { %824 = vxpose.xlu0.b32.end [16/16] (narrow) %v808_v26, 8 }
 0x384   : > { %v825_v27 = vpop.trf.xlu0 }
 0x385   : > { %841 = vst [vmem:[%s218_s12] sm:$0xf] %v825_v27 }
 0x386   : > { %1186 = shalt.err (!%p1183_p3)
}
 0x387   : > { %s1187_s6 = scalar_lea.hbm %s1497_s17, 64  ;;  %s1191_s9 = scalar_lea.hbm %s1542_s5, 128 }
 0x388   : > { %p1188_p4 = scmp.ne.s32.totalorder %s1497_s17, %s1187_s6  ;;  %p1192_p9 = scmp.lt.u32.totalorder %s1497_s17, %s1542_s5 }
 0x389   : > { %p1193_p10 = scmp.lt.u32.totalorder %s1191_s9, %s1187_s6  ;;  %p1195_p12 = scmp.lt.u32.totalorder %s1187_s6, %s1497_s17 }
 0x38a   : > { %p1189_p7 = pnand %p1188_p4, %p1306_p5 }
 0x38b   : > { %p1194_p11 = por %p1193_p10, %p1192_p9 }
 0x38c   : > { %p1190_p8 = pneg %p1189_p7 }
 0x38d   : > { %p1196_p13 = por %p1195_p12, %p1194_p11 }
 0x38f   : > { %p1197_p0 = pnand %p1196_p13, %p1190_p8 }
 0x391   : > { %1200 = shalt.err (!%p1197_p0)
}
 0x392   : > { %1070 = dma.vmem_to_hbm [thread:$0]  (%p1306_p5), %s1492_s13, 64, %s1497_s17, %s843_s23  }
 0x393 PF: > { %p1076_p1 = scmp.ge.s32.totalorder %s1235_s21, 2  ;;  %s868_s12 = sand.u32 1, %s1223_s18  }
 0x394   : > { %s869_s14 = scalar_lea.sflag [#allocation3], %s868_s12 }
 0x395   : > { %p1073_p2 = pnand %p1076_p1, %p1310_p6 }
 0x397   : > { %1218 = dma.done.wait (!%p1073_p2), %s869_s14, 64  }
 0x398   : > { %1220 = vsyncadd (!%p1073_p2), %s869_s14, 4294967232  ;;  %p15_p3 = scmp.ge.s32.totalorder %s1293_s24, 4   ;;  %s1545_s18 = smov %s1227_s19 }
 0x399   : > { %s1546_s19 = smov %s1231_s20  ;;  %s1547_s20 = smov %s1304_s27 }
 0x39a   : > { %s1548_s21 = smov %s1293_s24  ;;  %17 = sbr.rel (!%p15_p3) target bundleno = 3 (0x3), region = 75 }
 0x3a1   :  { %874 = vsyncpa [#allocation3], 1 }
 0x3a2   :  { %876 = vsyncpa [#allocation3 + $0x1], 1 }

</bundles_post_ra>
